<compile_context>
chip_gen: v5e
topology: v5e:2x2
jax: 0.10.0
libtpu: 0.0.40
codegen_flags: <defaults>
</compile_context>

<pallas_src>
import math
import functools

import jax
import jax.numpy as jnp
from jax.experimental import pallas as pl
from jax.experimental.pallas import tpu as pltpu


_HALO = 4                        # rows of edge-replicated halo per erode row-tile side
                                 # (only +-1 is needed; 4 keeps the halo'd tile height
                                 #  a multiple of 8 for the sublane tiling constraint)
_VMEM_LIMIT = 32 * 1024 * 1024   # raise v5e's 16 MiB default; still within v7x's 64 MiB


def _pick_row_tile(h, pref=128):
    """Largest multiple-of-8 divisor of h that is <= pref (falls back to full h)."""
    t = min(pref, h)
    t -= t % 8
    while t >= 8:
        if h % t == 0:
            return t
        t -= 8
    return h


# ----------------------------------------------------------------------------- kernels
def _rgba_over_white_kernel(rgba_ref, rgb_ref):
    # rgba_ref: (4, TILE_H, W), rgb_ref: (3, TILE_H, W)
    a = rgba_ref[3]                                          # (TILE_H, W)
    rgb_ref[...] = rgba_ref[0:3] * a[None] + (1.0 - a)[None]


def _rotate_normals_kernel(rgb_ref, alpha_ref, rot_ref, out_ref):
    # rgb_ref:   (1, 3, TILE_H, W)   raw normal-map RGB in [0, 1]
    # alpha_ref: (1, 1, TILE_H, W)   alpha passed through to channel 3
    # rot_ref:   (V*12,) in SMEM     per view: 9 rotation entries + 3 affine biases
    # out_ref:   (1, 4, TILE_H, W)
    v = pl.program_id(0)
    base = v * 12
    n0 = rgb_ref[0, 0]
    n1 = rgb_ref[0, 1]
    n2 = rgb_ref[0, 2]
    for c in range(3):                                       # unrolled VPU FMAs, no MXU
        r0 = rot_ref[base + 3 * c + 0]
        r1 = rot_ref[base + 3 * c + 1]
        r2 = rot_ref[base + 3 * c + 2]
        b = rot_ref[base + 9 + c]
        out_ref[0, c] = r0 * n0 + r1 * n1 + r2 * n2 + b
    out_ref[0, 3] = alpha_ref[0, 0]


def _erode_concat_kernel(rgb_ref, ahalo_ref, out_ref):
    # rgb_ref:   (1, 3, TILE_H, W)            RGB channels (copied through)
    # ahalo_ref: (1, 1, TILE_H + 2*_HALO, W)  alpha row-tile with edge-replicated halo
    # out_ref:   (1, 4, TILE_H, W)            RGB | 3x3-min-eroded alpha
    a = ahalo_ref[0, 0]                                      # (TILE_H + 2*_HALO, W)
    w = a.shape[1]
    col = jax.lax.broadcasted_iota(jnp.int32, a.shape, 1)
    # horizontal 3-tap min with replicate padding (XLU roll + boundary fix)
    left = jnp.where(col == 0, a, pltpu.roll(a, shift=1, axis=1))
    right = jnp.where(col == w - 1, a, pltpu.roll(a, shift=w - 1, axis=1))
    hmin = jnp.minimum(jnp.minimum(left, right), a)
    # separable erosion: vertical 3-tap min of the horizontal result (halo rows supply
    # the neighbors across tile boundaries; image borders are edge-replicated)
    th = out_ref.shape[2]
    up = hmin[_HALO - 1:_HALO - 1 + th]
    mid = hmin[_HALO:_HALO + th]
    dn = hmin[_HALO + 1:_HALO + 1 + th]
    out_ref[0, 3] = jnp.minimum(jnp.minimum(up, dn), mid)
    out_ref[0, 0:3] = rgb_ref[0]


# ---------------------------------------------------------------------------- wrappers
def rgba_to_rgb(rgba, tile_h=None):
    # rgba: (4, H, W) -> (3, H, W), composited over a white background.
    c, h, w = rgba.shape
    assert c == 4
    th = _pick_row_tile(h) if tile_h is None else tile_h
    return pl.pallas_call(
        _rgba_over_white_kernel,
        out_shape=jax.ShapeDtypeStruct((3, h, w), jnp.float32),
        grid=(h // th,),
        in_specs=[pl.BlockSpec((4, th, w), lambda r: (0, r, 0))],
        out_specs=pl.BlockSpec((3, th, w), lambda r: (0, r, 0)),
        compiler_params=pltpu.CompilerParams(
            dimension_semantics=("parallel",),
            vmem_limit_bytes=_VMEM_LIMIT),
    )(rgba)


def rotate_normals_with_alpha(normals_rgb, alphas, rotations, tile_h=None):
    # normals_rgb: (V, 3, H, W) in [0,1]; alphas: (V, 1, H, W); rotations: (V, 3, 3)
    # returns (V, 4, H, W) = rotated-normal RGB | pass-through alpha (fused concat).
    v, c, h, w = normals_rgb.shape
    assert c == 3 and alphas.shape == (v, 1, h, w) and rotations.shape == (v, 3, 3)
    th = _pick_row_tile(h) if tile_h is None else tile_h
    # Fold the [0,1]->[-1,1] decode and the *0.5+0.5 re-encode into an affine bias:
    #   out = 0.5 * (R @ (2x - 1)) + 0.5 = R @ x + 0.5 * (1 - R @ 1)
    bias = 0.5 * (1.0 - jnp.sum(rotations, axis=2))                       # (V, 3)
    table = jnp.concatenate([rotations.reshape(v, 9), bias],
                            axis=1).reshape(-1).astype(jnp.float32)       # (V*12,)
    return pl.pallas_call(
        _rotate_normals_kernel,
        out_shape=jax.ShapeDtypeStruct((v, 4, h, w), jnp.float32),
        grid=(v, h // th),
        in_specs=[
            pl.BlockSpec((1, 3, th, w), lambda i, r: (i, 0, r, 0)),
            pl.BlockSpec((1, 1, th, w), lambda i, r: (i, 0, r, 0)),
            pl.BlockSpec(memory_space=pltpu.MemorySpace.SMEM),            # scalar table
        ],
        out_specs=pl.BlockSpec((1, 4, th, w), lambda i, r: (i, 0, r, 0)),
        compiler_params=pltpu.CompilerParams(
            dimension_semantics=("parallel", "parallel"),
            vmem_limit_bytes=_VMEM_LIMIT),
    )(normals_rgb, alphas, table)


def erode_concat_rgba(rgbs, alphas, tile_h=None):
    # rgbs: (N, 3, H, W); alphas: (N, H, W) -> (N, 4, H, W) with 3x3-min-eroded alpha.
    n, c, h, w = rgbs.shape
    assert c == 3 and alphas.shape == (n, h, w)
    th = _pick_row_tile(h) if tile_h is None else tile_h
    nrt = h // th
    # Materialize row tiles with an edge-replicated halo so the vertical 3-tap min is
    # correct across row-tile boundaries (cheap: alpha is 1/4 of the per-view data).
    apad = jnp.pad(alphas, ((0, 0), (_HALO, _HALO), (0, 0)), mode="edge")  # (N, H+8, W)
    ahalo = jnp.stack(
        [apad[:, r * th: r * th + th + 2 * _HALO, :] for r in range(nrt)],
        axis=1)                                                # (N, nrt, TILE_H+8, W)
    return pl.pallas_call(
        _erode_concat_kernel,
        out_shape=jax.ShapeDtypeStruct((n, 4, h, w), jnp.float32),
        grid=(n, nrt),
        in_specs=[
            pl.BlockSpec((1, 3, th, w), lambda i, r: (i, 0, r, 0)),
            pl.BlockSpec((1, 1, th + 2 * _HALO, w), lambda i, r: (i, r, 0, 0)),
        ],
        out_specs=pl.BlockSpec((1, 4, th, w), lambda i, r: (i, 0, r, 0)),
        compiler_params=pltpu.CompilerParams(
            dimension_semantics=("parallel", "parallel"),
            vmem_limit_bytes=_VMEM_LIMIT),
    )(rgbs, ahalo)


# ------------------------------------------------------------------------------ module
class Unique3dDiffuserPallas:
    """Pallas analogue of Unique3dDiffuser.forward at the tensor level."""

    def __init__(self, seed=0):
        self.seed = int(seed)
        # Deterministic "parameters": per-view camera rotations (azimuth 0/90/180/270
        # degrees around the up axis) used by rotate_normals_torch.
        mats = []
        for deg in (0.0, 90.0, 180.0, 270.0):
            t = math.radians(deg)
            c, s = math.cos(t), math.sin(t)
            mats.append([[c, 0.0, s], [0.0, 1.0, 0.0], [-s, 0.0, c]])
        self.view_rotations = jnp.asarray(mats, dtype=jnp.float32)        # (4, 3, 3)

    def forward(self, front_rgba, mv_rgbs, mv_normal_preds):
        """
        front_rgba      : (4, H, W)      input front image (RGBA, [0,1])
        mv_rgbs         : (3, 3, H, W)   stands in for diffusion multiview RGB outputs
        mv_normal_preds : (4, 4, H, W)   stands in for diffusion normal-map outputs (RGBA)
        returns (img_list, mv_normals), both (4, 4, H, W)
        """
        # TODO(synk): img2mvimg / img2normal diffusion UNet sampling, ControlNet tile
        #             img2img refine and RealESRGAN super-resolution have no Pallas
        #             equivalent; mv_rgbs / mv_normal_preds stand in for those outputs.
        #             (rgba_to_rgb, their RGBA->RGB preprocessing, is exercised
        #             standalone in __main__ since its consumer is not implemented.)
        # TODO(synk): LANCZOS PIL resizes to 512 / 2048 not implemented (non-tensor glue).

        # --- img2normal: rotate_normals_torch fused with the alpha-channel concat -----
        # mv_normals[0] takes its alpha from the front image; views 1..3 keep their own.
        alphas = jnp.concatenate(
            [front_rgba[None, 3:4], mv_normal_preds[1:, 3:4]], axis=0)    # (4,1,H,W)
        mv_normals = rotate_normals_with_alpha(
            mv_normal_preds[:, 0:3], alphas, self.view_rotations)         # (4,4,H,W)

        # --- img_list: front stays RGBA; views 1..3 = mv RGB | eroded normal alpha ----
        # (3x3 min-erosion and the channel concat are fused into one Pallas kernel)
        # TODO(synk): border mode is replicate padding; verify against the reference
        #             erode_alpha's border handling if exact border parity is required.
        img_rest = erode_concat_rgba(mv_rgbs, mv_normal_preds[1:, 3])     # (3,4,H,W)
        img_list = jnp.concatenate([front_rgba[None], img_rest], axis=0)  # (4,4,H,W)

        return img_list, mv_normals

    __call__ = forward


# ------------------------------------------------------------------- pure-JAX reference
def _reference_forward(front_rgba, mv_rgbs, mv_normal_preds, rotations):
    n = mv_normal_preds[:, 0:3] * 2.0 - 1.0
    rot = jnp.einsum("vij,vjhw->vihw", rotations, n,
                     precision=jax.lax.Precision.HIGHEST) * 0.5 + 0.5
    alphas = jnp.concatenate([front_rgba[None, 3:4], mv_normal_preds[1:, 3:4]], axis=0)
    mv_normals = jnp.concatenate([rot, alphas], axis=1)
    a = mv_normal_preds[1:, 3]
    h, w = a.shape[-2:]
    ap = jnp.pad(a, ((0, 0), (1, 1), (1, 1)), mode="edge")
    taps = [ap[:, 1 + di:1 + di + h, 1 + dj:1 + dj + w]
            for di in (-1, 0, 1) for dj in (-1, 0, 1)]
    er = functools.reduce(jnp.minimum, taps)
    img_rest = jnp.concatenate([mv_rgbs, er[:, None]], axis=1)
    img_list = jnp.concatenate([front_rgba[None], img_rest], axis=0)
    return img_list, mv_normals


# -------------------------------------------------------------------------------- main
if __name__ == "__main__":
    # Small stand-in for the 512 / 2048 production resolutions; W is a multiple of 128
    # so every block is lane-dense, and H/TILE_H = 2 so the row-tiling + halo path runs.
    H = W = 256
    key = jax.random.PRNGKey(0)
    k1, k2, k3 = jax.random.split(key, 3)

    front_rgba = jax.random.uniform(k1, (4, H, W), dtype=jnp.float32)          # RGBA
    mv_rgbs = jax.random.uniform(k2, (3, 3, H, W), dtype=jnp.float32)          # 3 views RGB
    mv_normal_preds = jax.random.uniform(k3, (4, 4, H, W), dtype=jnp.float32)  # 4 views RGBA

    # Mirrors `assert np.mean(np.array(img_list[0])[..., 3]) < 250` from the original,
    # done on the host up front so it never serializes device-side kernel dispatch.
    assert float(jnp.mean(front_rgba[3])) < 250.0 / 255.0

    model = Unique3dDiffuserPallas(seed=0)

    # img2mvimg / img2normal preprocessing (RGBA -> RGB over white); its consumer (the
    # diffusion UNet) is a TODO, so it is exercised here rather than as dead work in
    # forward().
    front_rgb = rgba_to_rgb(front_rgba)

    fwd = jax.jit(model.forward)
    img_list, mv_normals = fwd(front_rgba, mv_rgbs, mv_normal_preds)
    jax.block_until_ready((front_rgb, img_list, mv_normals))

    # correctness vs a pure-JAX reference
    assert img_list.shape == (4, 4, H, W) and mv_normals.shape == (4, 4, H, W)
    ref_rgb = front_rgba[0:3] * front_rgba[3:4] + (1.0 - front_rgba[3:4])
    ref_img_list, ref_mv_normals = _reference_forward(
        front_rgba, mv_rgbs, mv_normal_preds, model.view_rotations)
    assert jnp.allclose(front_rgb, ref_rgb, atol=1e-5)
    assert jnp.allclose(img_list, ref_img_list, atol=1e-5)
    assert jnp.allclose(mv_normals, ref_mv_normals, atol=1e-5)

    print("KERNEL_OK")
</pallas_src>

<mosaic_0001>
module attributes {stable_mosaic.version = 11 : i64} {
  func.func @_rgba_over_white_kernel(%arg0: i32, %arg1: memref<4x128x256xf32, #tpu.memory_space<vmem>>, %arg2: memref<3x128x256xf32, #tpu.memory_space<vmem>>) attributes {dimension_semantics = [#tpu.dimension_semantics<parallel>], iteration_bounds = array<i64: 2>, scalar_prefetch = 0 : i64, scratch_operands = 0 : i64, tpu.core_type = #tpu.core_type<tc>, window_params = [{transform_indices = @transform_0, window_bounds = array<i64: 4, 128, 256>}, {transform_indices = @transform_1, window_bounds = array<i64: 3, 128, 256>}]} {
    %c3 = arith.constant 3 : index
    %c0 = arith.constant 0 : index
    %c0_0 = arith.constant 0 : index
    %0 = vector.load %arg1[%c3, %c0, %c0_0] : memref<4x128x256xf32, #tpu.memory_space<vmem>>, vector<1x128x256xf32>
    %1 = vector.shape_cast %0 : vector<1x128x256xf32> to vector<128x256xf32>
    %c0_1 = arith.constant 0 : index
    %c0_2 = arith.constant 0 : index
    %c0_3 = arith.constant 0 : index
    %2 = vector.load %arg1[%c0_1, %c0_2, %c0_3] : memref<4x128x256xf32, #tpu.memory_space<vmem>>, vector<3x128x256xf32>
    %3 = vector.shape_cast %1 : vector<128x256xf32> to vector<1x128x256xf32>
    %4 = vector.broadcast %3 : vector<1x128x256xf32> to vector<3x128x256xf32>
    %5 = arith.mulf %2, %4 : vector<3x128x256xf32>
    %cst = arith.constant 1.000000e+00 : f32
    %6 = vector.broadcast %cst : f32 to vector<128x256xf32>
    %7 = arith.subf %6, %1 : vector<128x256xf32>
    %8 = vector.shape_cast %7 : vector<128x256xf32> to vector<1x128x256xf32>
    %9 = vector.broadcast %8 : vector<1x128x256xf32> to vector<3x128x256xf32>
    %10 = arith.addf %5, %9 : vector<3x128x256xf32>
    %c0_4 = arith.constant 0 : index
    %c0_5 = arith.constant 0 : index
    %c0_6 = arith.constant 0 : index
    %11 = vector.load %arg2[%c0_4, %c0_5, %c0_6] : memref<3x128x256xf32, #tpu.memory_space<vmem>>, vector<3x128x256xf32>
    tpu.vector_store %arg2[%c0_4, %c0_5, %c0_6], %10 {strides = array<i32>} : memref<3x128x256xf32, #tpu.memory_space<vmem>>, vector<3x128x256xf32>,
    return
  }
  func.func @transform_0(%arg0: i32) -> (i32, i32, i32) {
    %c0_i32 = arith.constant 0 : i32
    %c0_i32_0 = arith.constant 0 : i32
    %c0_i32_1 = arith.constant 0 : i32
    return %c0_i32, %arg0, %c0_i32_0 : i32, i32, i32
  }
  func.func @transform_1(%arg0: i32) -> (i32, i32, i32) {
    %c0_i32 = arith.constant 0 : i32
    %c0_i32_0 = arith.constant 0 : i32
    %c0_i32_1 = arith.constant 0 : i32
    return %c0_i32, %arg0, %c0_i32_0 : i32, i32, i32
  }
}

</mosaic_0001>

<bundles_post_ra>
// kernel: tpu_custom_call.1
= control target key start
LH: loop header
LB: loop body
LE: loop exit
PB: predicated region body
PF: predicated region fallthrough
CT: control target
= control target key end

     0   :  { %6 = vsyncpa [#allocation3], 0  ;;  %s1714_s0 = inlined_call_operand.hbm [shape: f32[4,256,256], index: 0, kind: input, shape index: {}]   ;;  %s1715_s1 = inlined_call_operand.hbm [shape: f32[3,256,256], index: 1, kind: output, shape index: {}]  }
   0x1   :  { %8 = vsyncpa [#allocation3 + $0x1], 0 }
   0x2   :  { %9 = vsyncpa [#allocation4], 0 }
   0x3   :  { %11 = vsyncpa [#allocation4 + $0x1], 0  ;;  %s906_s6 = smov 0   ;;  %s908_s7 = smov 0  }
   0x4   :  { %s910_s8 = smov 0   ;;  %s912_s9 = smov 0  }
   0x5 LB: > { %s927_s10 = sadd.s32 4294967295, %s883_s9   ;;  %s727_s11 = sadd.s32 4294967294, %s883_s9   ;;  %s883_s9 = sphi %s912_s9, %s1840_s9   ;;  %s879_s8 = sphi %s910_s8, %s1839_s8   ;;  %s875_s7 = sphi %s908_s7, %s1838_s7   ;;  %s871_s6 = sphi %s906_s6, %s1837_s6  }
   0x6   : > { %s931_s12 = sadd.s32 1, %s883_s9   ;;  %s24_s13 = sadd.s32 1, %s879_s8 }
   0x7   : > { %s21_s14 = ssub.s32 %s883_s9, %s931_s12  ;;  %p31_p0 = scmp.ne.s32.totalorder %s879_s8, %s875_s7 }
   0x8   : > { %p22_p1 = scmp.eq.s32.totalorder %s21_s14, 0  ;;  %p32_p2 = scmp.eq.s32.totalorder %s883_s9, 0 }
   0x9   : > { %p37_p3 = scmp.ne.s32.totalorder %s875_s7, %s871_s6  ;;  %p38_p4 = scmp.eq.s32.totalorder %s927_s10, 0 }
   0xa   : > { %s943_s15 = scalar_select %p22_p1, %s879_s8, %s24_s13  }
   0xb   : > { %p945_p5 = por %p32_p2, %p31_p0  ;;  %p949_p6 = por %p38_p4, %p37_p3 }
   0xc   : > { %p61_p7 = scmp.eq.s32.totalorder %s927_s10, 1  ;;  %p67_p8 = scmp.eq.s32.totalorder %s727_s11, 1 }
   0xd   : > { %p729_p11 = scmp.ge.s32.totalorder %s883_s9, 2 }
   0xe   : > { %p954_p9 = por %p61_p7, %p31_p0  ;;  %p958_p10 = por %p67_p8, %p37_p3 }
   0xf   : > { %83 = sbr.rel (%p729_p11) target bundleno = 33 (0x21), region = 16 }
  0x14   : > { %s87_s20 = sand.u32 1, %s879_s8   ;;  %s776_s21 = sshll.u32 %s883_s9, 8 }
  0x15   : > { %s730_s22 = sshll.u32 %s87_s20, 10  ;;  %s97_s25 = scalar_lea.hbm %s1714_s0, %s776_s21 }
  0x16   : > { %s780_s26 = scalar_select %p945_p5, [#allocation0], [#allocation10] }
  0x17   : > { %s110_s27 = sshll.u32 %s97_s25, 4  ;;  %s91_s28 = scalar_lea.vmem [#allocation2], %s730_s22  ;;  %s111_s27 = int_to_ptr.hbm [resolvable:$true] %s110_s27 }
  0x18   : > { %s112_s29 = sshll.u32 %s91_s28, 4  ;;  %s102_s30 = sld [smem:[%s780_s26]]   ;;  %s113_s29 = int_to_ptr.vmem [resolvable:$true] %s112_s29 }
  0x19   : > { %s885_s2 = smov 8192   ;;  %s886_s3 = smov 4096  }
  0x1a   : > { %781 = sst [smem:[#allocation7]] (%p945_p5), %s885_s2  ;;  %s887_s4 = smov 16  }
  0x1b   : > { %782 = sst [smem:[#allocation7 + $0x1]] (%p945_p5), %s886_s3  ;;  %s888_s5 = smov 256  }
  0x1c   : > { %783 = sst [smem:[#allocation7 + $0x2]] (%p945_p5), %s887_s4  ;;  %s88_s14 = scalar_lea.sflag [#allocation3], %s87_s20 }
  0x1d   : > { %784 = sst [smem:[#allocation7 + $0x3]] (%p945_p5), %s888_s5  ;;  %s889_s21 = smov [#allocation6]  }
  0x1e   : > { %s734_s11 = sshll.u32 %s102_s30, 26  ;;  %785 = sst [smem:[#allocation7 + $0x4]] (%p945_p5), %s888_s5 }
  0x1f   : > { %s735_s13 = sadd.s32 134217728, %s734_s11  ;;  %786 = sst [smem:[#allocation7 + $0x5]] (%p945_p5), %s887_s4 }
  0x20   : > { %787 = dma.general (%p945_p5), %s111_s27, 16384, %s113_s29, %s88_s14, %s889_s21, [#allocation7], %s735_s13, 0  }
  0x21 PF: > { %p736_p12 = scmp.ge.s32.totalorder %s883_s9, 1  ;;  %p133_p13 = scmp.lt.s32.totalorder %s883_s9, 3 }
  0x23   : > { %p134_p0 = pnand %p736_p12, %p133_p13 }
  0x25   : > { %137 = sbr.rel (%p134_p0) target bundleno = 189 (0xbd), region = 24 }
  0x2a   : > { %s989_s22 = sand.u32 1, %s875_s7  }
  0x2b   : > { %s737_s23 = sshll.u32 %s989_s22, 10  ;;  %s140_s24 = scalar_lea.sflag [#allocation3], %s989_s22 }
  0x2c   : > { %s993_s25 = scalar_lea.vmem [#allocation2], %s737_s23 }
  0x2d   : > { %862 = dma.done.wait (%p949_p6), %s140_s24, 16384  }
  0x2e   : > { %864 = vsyncadd (%p949_p6), %s140_s24, 4294950912  ;;  %s779_s16 = smul.u32 768, %s989_s22  ;;  %v1001_v0 = vld [vmem:[%s993_s25 + $0x300] sm:$0xff]  ;;  %v1005_v2 = vld [vmem:[%s993_s25 + $0x308] sm:$0xff]  ;;  %s615_s20 = scalar_lea.sflag [#allocation4], %s989_s22 }
  0x2f   : > { %v198_v1 = vld [vmem:[%s993_s25] sm:$0xff]  ;;  %v1009_v4 = vsub.f32 1.0, %v1001_v0  ;;  %v199_v5 = vld [vmem:[%s993_s25 + $0x8] sm:$0xff]  ;;  %v1013_v6 = vsub.f32 1.0, %v1005_v2  ;;  %v1016_v7 = vld [vmem:[%s993_s25 + $0x310] sm:$0xff] }
  0x30   : > { %v294_v3 = vmul.f32 %v1001_v0, %v198_v1  ;;  %v200_v8 = vld [vmem:[%s993_s25 + $0x10] sm:$0xff]  ;;  %v295_v9 = vmul.f32 %v1005_v2, %v199_v5  ;;  %v1022_v11 = vsub.f32 1.0, %v1016_v7  ;;  %v1025_v12 = vld [vmem:[%s993_s25 + $0x318] sm:$0xff]  ;;  %v1029_v14 = vld [vmem:[%s993_s25 + $0x320] sm:$0xff]  ;;  %s1057_s17 = scalar_lea.vmem [#allocation5], %s779_s16 }
  0x31   : > { %v296_v10 = vmul.f32 %v1016_v7, %v200_v8  ;;  %v201_v13 = vld [vmem:[%s993_s25 + $0x18] sm:$0xff]  ;;  %v1034_v17 = vsub.f32 1.0, %v1025_v12  ;;  %v202_v18 = vld [vmem:[%s993_s25 + $0x20] sm:$0xff]  ;;  %v1038_v19 = vsub.f32 1.0, %v1029_v14  ;;  %v1041_v20 = vld [vmem:[%s993_s25 + $0x328] sm:$0xff] }
  0x32   : > { %v422_v15 = vadd.f32 %v1009_v4, %v294_v3  ;;  %v297_v16 = vmul.f32 %v1025_v12, %v201_v13  ;;  %v203_v21 = vld [vmem:[%s993_s25 + $0x28] sm:$0xff]  ;;  %v423_v22 = vadd.f32 %v1013_v6, %v295_v9  ;;  %v298_v24 = vmul.f32 %v1029_v14, %v202_v18  ;;  %v1049_v26 = vld [vmem:[%s993_s25 + $0x330] sm:$0xff]  ;;  %v1053_v28 = vld [vmem:[%s993_s25 + $0x338] sm:$0xff] }
  0x33   : > { %v424_v23 = vadd.f32 %v1022_v11, %v296_v10  ;;  %v299_v25 = vmul.f32 %v1041_v20, %v203_v21  ;;  %v204_v27 = vld [vmem:[%s993_s25 + $0x30] sm:$0xff]  ;;  %v1062_v30 = vsub.f32 1.0, %v1041_v20  ;;  %v1066_v32 = vsub.f32 1.0, %v1049_v26  ;;  %v205_v33 = vld [vmem:[%s993_s25 + $0x38] sm:$0xff]  ;;  %v1070_v34 = vld [vmem:[%s993_s25 + $0x340] sm:$0xff] }
  0x34   : > { %518 = vst [vmem:[%s1057_s17] sm:$0xff] %v422_v15  ;;  %v425_v29 = vadd.f32 %v1034_v17, %v297_v16  ;;  %v300_v31 = vmul.f32 %v1049_v26, %v204_v27  ;;  %v206_v35 = vld [vmem:[%s993_s25 + $0x40] sm:$0xff]  ;;  %v426_v36 = vadd.f32 %v1038_v19, %v298_v24  ;;  %v301_v37 = vmul.f32 %v1053_v28, %v205_v33  ;;  %v1081_v40 = vld [vmem:[%s993_s25 + $0x348] sm:$0xff]  ;;  %v1085_v42 = vld [vmem:[%s993_s25 + $0x350] sm:$0xff] }
  0x35   : > { %519 = vst [vmem:[%s1057_s17 + $0x8] sm:$0xff] %v423_v22  ;;  %v1077_v38 = vsub.f32 1.0, %v1053_v28  ;;  %v302_v39 = vmul.f32 %v1070_v34, %v206_v35  ;;  %v207_v41 = vld [vmem:[%s993_s25 + $0x48] sm:$0xff]  ;;  %v427_v43 = vadd.f32 %v1062_v30, %v299_v25  ;;  %v1091_v45 = vsub.f32 1.0, %v1070_v34  ;;  %v208_v47 = vld [vmem:[%s993_s25 + $0x50] sm:$0xff]  ;;  %v1096_v48 = vld [vmem:[%s993_s25 + $0x358] sm:$0xff] }
  0x36   : > { %520 = vst [vmem:[%s1057_s17 + $0x10] sm:$0xff] %v424_v23  ;;  %v428_v44 = vadd.f32 %v1066_v32, %v300_v31  ;;  %v303_v46 = vmul.f32 %v1081_v40, %v207_v41  ;;  %v209_v49 = vld [vmem:[%s993_s25 + $0x58] sm:$0xff]  ;;  %v1102_v51 = vsub.f32 1.0, %v1081_v40  ;;  %v304_v52 = vmul.f32 %v1085_v42, %v208_v47  ;;  %v1109_v54 = vld [vmem:[%s993_s25 + $0x360] sm:$0xff]  ;;  %v1113_v56 = vld [vmem:[%s993_s25 + $0x368] sm:$0xff] }
  0x37   : > { %521 = vst [vmem:[%s1057_s17 + $0x18] sm:$0xff] %v425_v29  ;;  %v429_v50 = vadd.f32 %v1077_v38, %v301_v37  ;;  %v1106_v53 = vsub.f32 1.0, %v1085_v42  ;;  %v210_v55 = vld [vmem:[%s993_s25 + $0x60] sm:$0xff]  ;;  %v430_v57 = vadd.f32 %v1091_v45, %v302_v39  ;;  %v305_v58 = vmul.f32 %v1096_v48, %v209_v49  ;;  %v211_v61 = vld [vmem:[%s993_s25 + $0x68] sm:$0xff]  ;;  %v1124_v62 = vld [vmem:[%s993_s25 + $0x370] sm:$0xff] }
  0x38   : > { %522 = vst [vmem:[%s1057_s17 + $0x20] sm:$0xff] %v426_v36  ;;  %v1119_v59 = vsub.f32 1.0, %v1096_v48  ;;  %v306_v60 = vmul.f32 %v1109_v54, %v210_v55  ;;  %v212_v63 = vld [vmem:[%s993_s25 + $0x70] sm:$0xff]  ;;  %v431_v1 = vadd.f32 %v1102_v51, %v303_v46  ;;  %v1130_v3 = vsub.f32 1.0, %v1109_v54  ;;  %v1134_v8 = vld [vmem:[%s993_s25 + $0x378] sm:$0xff]  ;;  %v1138_v10 = vld [vmem:[%s993_s25 + $0x380] sm:$0xff] }
  0x39   : > { %523 = vst [vmem:[%s1057_s17 + $0x28] sm:$0xff] %v427_v43  ;;  %v307_v5 = vmul.f32 %v1113_v56, %v211_v61  ;;  %v213_v9 = vld [vmem:[%s993_s25 + $0x78] sm:$0xff]  ;;  %v432_v13 = vadd.f32 %v1106_v53, %v304_v52  ;;  %v1143_v15 = vsub.f32 1.0, %v1113_v56  ;;  %v308_v16 = vmul.f32 %v1124_v62, %v212_v63  ;;  %v214_v21 = vld [vmem:[%s993_s25 + $0x80] sm:$0xff]  ;;  %v1151_v22 = vld [vmem:[%s993_s25 + $0x388] sm:$0xff] }
  0x3a   : > { %1775 = vst [vmem:[#allocation13_spill] sm:$0xff] %v1138_v10  ;;  %v1147_v18 = vsub.f32 1.0, %v1124_v62  ;;  %v215_v23 = vld [vmem:[%s993_s25 + $0x88] sm:$0xff]  ;;  %v433_v24 = vadd.f32 %v1119_v59, %v305_v58  ;;  %v309_v25 = vmul.f32 %v1134_v8, %v213_v9  ;;  %v1158_v27 = vsub.f32 1.0, %v1134_v8  ;;  %v1161_v29 = vld [vmem:[%s993_s25 + $0x390] sm:$0xff]  ;;  %v1171_v37 = vld [vmem:[%s993_s25 + $0x398] sm:$0xff] }
  0x3b   : > { %524 = vst [vmem:[%s1057_s17 + $0x30] sm:$0xff] %v428_v44  ;;  %v216_v31 = vld [vmem:[%s993_s25 + $0x90] sm:$0xff]  ;;  %v434_v33 = vadd.f32 %v1130_v3, %v306_v60  ;;  %v310_v35 = vmul.f32 %v1138_v10, %v214_v21  ;;  %v1168_v36 = vsub.f32 1.0, %v1138_v10  ;;  %v217_v39 = vld [vmem:[%s993_s25 + $0x98] sm:$0xff]  ;;  %v435_v41 = vadd.f32 %v1143_v15, %v307_v5  ;;  %v1181_v46 = vld [vmem:[%s993_s25 + $0x3a0] sm:$0xff] }
  0x3c   : > { %525 = vst [vmem:[%s1057_s17 + $0x38] sm:$0xff] %v429_v50  ;;  %v311_v43 = vmul.f32 %v1151_v22, %v215_v23  ;;  %v1178_v44 = vsub.f32 1.0, %v1151_v22  ;;  %v218_v47 = vld [vmem:[%s993_s25 + $0xa0] sm:$0xff]  ;;  %v436_v49 = vadd.f32 %v1147_v18, %v308_v16  ;;  %v312_v50 = vmul.f32 %v1161_v29, %v216_v31  ;;  %v1191_v55 = vld [vmem:[%s993_s25 + $0x3a8] sm:$0xff]  ;;  %v1201_v63 = vld [vmem:[%s993_s25 + $0x3b0] sm:$0xff] }
  0x3d   : > { %526 = vst [vmem:[%s1057_s17 + $0x40] sm:$0xff] %v430_v57  ;;  %v1188_v52 = vsub.f32 1.0, %v1161_v29  ;;  %v219_v57 = vld [vmem:[%s993_s25 + $0xa8] sm:$0xff]  ;;  %v437_v58 = vadd.f32 %v1158_v27, %v309_v25  ;;  %v313_v60 = vmul.f32 %v1171_v37, %v217_v39  ;;  %v1198_v61 = vsub.f32 1.0, %v1171_v37  ;;  %v1211_v16 = vld [vmem:[%s993_s25 + $0x3b8] sm:$0xff]  ;;  %v1221_v31 = vld [vmem:[%s993_s25 + $0x3c0] sm:$0xff] }
  0x3e   : > { %527 = vst [vmem:[%s1057_s17 + $0x48] sm:$0xff] %v431_v1  ;;  %v220_v1 = vld [vmem:[%s993_s25 + $0xb0] sm:$0xff]  ;;  %v438_v5 = vadd.f32 %v1168_v36, %v310_v35  ;;  %v314_v9 = vmul.f32 %v1181_v46, %v218_v47  ;;  %v221_v21 = vld [vmem:[%s993_s25 + $0xb8] sm:$0xff]  ;;  %v439_v23 = vadd.f32 %v1178_v44, %v311_v43  ;;  %v1218_v25 = vsub.f32 1.0, %v1191_v55  ;;  %v1231_v43 = vld [vmem:[%s993_s25 + $0x3c8] sm:$0xff] }
  0x3f   : > { %1776 = vst [vmem:[#allocation14_spill] sm:$0xff] %v1178_v44  ;;  %v440_v35 = vadd.f32 %v1188_v52, %v312_v50  ;;  %v316_v39 = vmul.f32 %v1201_v63, %v220_v1  ;;  %v223_v47 = vld [vmem:[%s993_s25 + $0xc8] sm:$0xff]  ;;  %v1238_v50 = vsub.f32 1.0, %v1211_v16  ;;  %v224_v1 = vld [vmem:[%s993_s25 + $0xd0] sm:$0xff] }
  0x40   : > { %1777 = vst [vmem:[#allocation15_spill] sm:$0xff] %v1181_v46 }
  0x41   : > { %528 = vst [vmem:[%s1057_s17 + $0x50] sm:$0xff] %v432_v13  ;;  %v1208_v13 = vsub.f32 1.0, %v1181_v46  ;;  %v244_v46 = vld [vmem:[%s993_s25 + $0x170] sm:$0xff] }
  0x42   : > { %1778 = vst [vmem:[#allocation16_spill] sm:$0xff] %v1188_v52  ;;  %v1241_v52 = vld [vmem:[%s993_s25 + $0x3d0] sm:$0xff] }
  0x43   : > { %1779 = vst [vmem:[#allocation17_spill] sm:$0xff] %v1191_v55 }
  0x44   : > { %529 = vst [vmem:[%s1057_s17 + $0x58] sm:$0xff] %v433_v24  ;;  %v315_v24 = vmul.f32 %v1191_v55, %v219_v57  ;;  %v441_v57 = vadd.f32 %v1198_v61, %v313_v60  ;;  %v1248_v60 = vsub.f32 1.0, %v1221_v31 }
  0x45   : > { %1780 = vst [vmem:[#allocation18_spill] sm:$0xff] %v1198_v61  ;;  %v1251_v61 = vld [vmem:[%s993_s25 + $0x3d8] sm:$0xff] }
  0x46   : > { %1781 = vst [vmem:[#allocation19_spill] sm:$0xff] %v1201_v63 }
  0x47   : > { %530 = vst [vmem:[%s1057_s17 + $0x60] sm:$0xff] %v434_v33  ;;  %v222_v33 = vld [vmem:[%s993_s25 + $0xc0] sm:$0xff] }
  0x48   : > { %1782 = vst [vmem:[#allocation20_spill] sm:$0xff] %v1208_v13 }
  0x49   : > { %1783 = vst [vmem:[#allocation21_spill] sm:$0xff] %v1211_v16 }
  0x4a   : > { %531 = vst [vmem:[%s1057_s17 + $0x68] sm:$0xff] %v435_v41  ;;  %v1228_v41 = vsub.f32 1.0, %v1201_v63  ;;  %v442_v63 = vadd.f32 %v1208_v13, %v314_v9  ;;  %v1258_v9 = vsub.f32 1.0, %v1231_v43  ;;  %v1261_v13 = vld [vmem:[%s993_s25 + $0x3e0] sm:$0xff] }
  0x4b   : > { %1784 = vst [vmem:[#allocation22_spill] sm:$0xff] %v1218_v25 }
  0x4c   : > { %1785 = vst [vmem:[#allocation23_spill] sm:$0xff] %v1221_v31 }
  0x4d   : > { %532 = vst [vmem:[%s1057_s17 + $0x70] sm:$0xff] %v436_v49  ;;  %v317_v49 = vmul.f32 %v1211_v16, %v221_v21  ;;  %v225_v21 = vld [vmem:[%s993_s25 + $0xd8] sm:$0xff]  ;;  %v443_v16 = vadd.f32 %v1218_v25, %v315_v24  ;;  %v1268_v24 = vsub.f32 1.0, %v1241_v52  ;;  %v227_v25 = vld [vmem:[%s993_s25 + $0xe8] sm:$0xff] }
  0x4e   : > { %1786 = vst [vmem:[#allocation24_spill] sm:$0xff] %v1228_v41 }
  0x4f   : > { %1787 = vst [vmem:[#allocation25_spill] sm:$0xff] %v1231_v43 }
  0x50   : > { %533 = vst [vmem:[%s1057_s17 + $0x78] sm:$0xff] %v437_v58  ;;  %v318_v58 = vmul.f32 %v1221_v31, %v222_v33  ;;  %v226_v33 = vld [vmem:[%s993_s25 + $0xe0] sm:$0xff]  ;;  %v444_v31 = vadd.f32 %v1228_v41, %v316_v39  ;;  %v1278_v39 = vsub.f32 1.0, %v1251_v61  ;;  %v228_v41 = vld [vmem:[%s993_s25 + $0xf0] sm:$0xff] }
  0x51   : > { %1788 = vst [vmem:[#allocation26_spill] sm:$0xff] %v1238_v50  ;;  %v322_v55 = vmul.f32 %v1261_v13, %v226_v33  ;;  %v232_v33 = vld [vmem:[%s993_s25 + $0x110] sm:$0xff] }
  0x52   : > { %1789 = vst [vmem:[#allocation27_spill] sm:$0xff] %v1241_v52 }
  0x53   : > { %534 = vst [vmem:[%s1057_s17 + $0x80] sm:$0xff] %v438_v5  ;;  %v319_v5 = vmul.f32 %v1231_v43, %v223_v47  ;;  %v1271_v47 = vld [vmem:[%s993_s25 + $0x3e8] sm:$0xff]  ;;  %v445_v43 = vadd.f32 %v1238_v50, %v317_v49  ;;  %v1291_v49 = vld [vmem:[%s993_s25 + $0x3f8] sm:$0xff]  ;;  %v230_v50 = vld [vmem:[%s993_s25 + $0x100] sm:$0xff] }
  0x54   : > { %1790 = vst [vmem:[#allocation28_spill] sm:$0xff] %v1248_v60  ;;  %v323_v44 = vmul.f32 %v1271_v47, %v227_v25 }
  0x55   : > { %1791 = vst [vmem:[#allocation29_spill] sm:$0xff] %v1251_v61 }
  0x56   : > { %535 = vst [vmem:[%s1057_s17 + $0x88] sm:$0xff] %v439_v23  ;;  %v320_v23 = vmul.f32 %v1241_v52, %v224_v1  ;;  %v1281_v1 = vld [vmem:[%s993_s25 + $0x3f0] sm:$0xff]  ;;  %v446_v52 = vadd.f32 %v1248_v60, %v318_v58  ;;  %v231_v58 = vld [vmem:[%s993_s25 + $0x108] sm:$0xff] }
  0x57   : > { %1792 = vst [vmem:[#allocation30_spill] sm:$0xff] %v1258_v9  ;;  %v324_v60 = vmul.f32 %v1281_v1, %v228_v41 }
  0x58   : > { %1793 = vst [vmem:[#allocation31_spill] sm:$0xff] %v1261_v13 }
  0x59   : > { %536 = vst [vmem:[%s1057_s17 + $0x90] sm:$0xff] %v440_v35  ;;  %v321_v35 = vmul.f32 %v1251_v61, %v225_v21  ;;  %v229_v21 = vld [vmem:[%s993_s25 + $0xf8] sm:$0xff]  ;;  %v447_v61 = vadd.f32 %v1258_v9, %v319_v5  ;;  %v242_v9 = vld [vmem:[%s993_s25 + $0x160] sm:$0xff] }
  0x5a   : > { %1794 = vst [vmem:[#allocation32_spill] sm:$0xff] %v1268_v24  ;;  %v325_v5 = vmul.f32 %v1291_v49, %v229_v21 }
  0x5b   : > { %1795 = vst [vmem:[#allocation33_spill] sm:$0xff] %v1271_v47  ;;  %v449_v25 = vadd.f32 %v1278_v39, %v321_v35  ;;  %v233_v35 = vld [vmem:[%s993_s25 + $0x118] sm:$0xff] }
  0x5c   : > { %537 = vst [vmem:[%s1057_s17 + $0x98] sm:$0xff] %v441_v57  ;;  %v1288_v57 = vsub.f32 1.0, %v1261_v13  ;;  %v448_v13 = vadd.f32 %v1268_v24, %v320_v23  ;;  %v328_v23 = vmul.f32 %v1016_v7, %v232_v33  ;;  %v241_v33 = vld [vmem:[%s993_s25 + $0x158] sm:$0xff] }
  0x5d   : > { %1796 = vst [vmem:[#allocation34_spill] sm:$0xff] %v1278_v39  ;;  %v234_v39 = vld [vmem:[%s993_s25 + $0x120] sm:$0xff] }
  0x5e   : > { %1797 = vst [vmem:[#allocation35_spill] sm:$0xff] %v1281_v1  ;;  %v450_v41 = vadd.f32 %v1288_v57, %v322_v55 }
  0x5f   : > { %538 = vst [vmem:[%s1057_s17 + $0xa0] sm:$0xff] %v442_v63  ;;  %v1299_v63 = vsub.f32 1.0, %v1271_v47  ;;  %v1313_v47 = vsub.f32 1.0, %v1291_v49 }
  0x60   : > { %1798 = vst [vmem:[#allocation36_spill] sm:$0xff] %v1288_v57  ;;  %v239_v57 = vld [vmem:[%s993_s25 + $0x148] sm:$0xff] }
  0x61   : > { %1799 = vst [vmem:[#allocation37_spill] sm:$0xff] %v1291_v49  ;;  %v451_v21 = vadd.f32 %v1299_v63, %v323_v44  ;;  %v238_v49 = vld [vmem:[%s993_s25 + $0x140] sm:$0xff]  ;;  %v453_v24 = vadd.f32 %v1313_v47, %v325_v5  ;;  %v329_v44 = vmul.f32 %v1025_v12, %v233_v35 }
  0x62   : > { %539 = vst [vmem:[%s1057_s17 + $0xa8] sm:$0xff] %v443_v16  ;;  %v1307_v16 = vsub.f32 1.0, %v1281_v1  ;;  %v235_v1 = vld [vmem:[%s993_s25 + $0x128] sm:$0xff] }
  0x63   : > { %1800 = vst [vmem:[#allocation38_spill] sm:$0xff] %v1299_v63  ;;  %v330_v63 = vmul.f32 %v1029_v14, %v234_v39  ;;  %v334_v39 = vmul.f32 %v1070_v34, %v238_v49 }
  0x64   : > { %540 = vst [vmem:[%s1057_s17 + $0xb0] sm:$0xff] %v444_v31  ;;  %v326_v31 = vmul.f32 %v1001_v0, %v230_v50  ;;  %v236_v50 = vld [vmem:[%s993_s25 + $0x130] sm:$0xff]  ;;  %v452_v55 = vadd.f32 %v1307_v16, %v324_v60 }
  0x65   : > { %1801 = vst [vmem:[#allocation39_spill] sm:$0xff] %v1307_v16  ;;  %v456_v16 = vadd.f32 %v1022_v11, %v328_v23  ;;  %v332_v5 = vmul.f32 %v1049_v26, %v236_v50  ;;  %v338_v23 = vmul.f32 %v1109_v54, %v242_v9  ;;  %v340_v50 = vmul.f32 %v1124_v62, %v244_v46  ;;  %v248_v46 = vld [vmem:[%s993_s25 + $0x190] sm:$0xff] }
  0x66   : > { %541 = vst [vmem:[%s1057_s17 + $0xb8] sm:$0xff] %v445_v43  ;;  %v327_v43 = vmul.f32 %v1005_v2, %v231_v58  ;;  %v240_v58 = vld [vmem:[%s993_s25 + $0x150] sm:$0xff] }
  0x67   : > { %1802 = vst [vmem:[#allocation40_spill] sm:$0xff] %v1313_v47  ;;  %v335_v47 = vmul.f32 %v1081_v40, %v239_v57  ;;  %v457_v57 = vadd.f32 %v1034_v17, %v329_v44  ;;  %v460_v9 = vadd.f32 %v1066_v32, %v332_v5  ;;  %v263_v5 = vld [vmem:[%s993_s25 + $0x208] sm:$0xff] }
  0x68   : > { %542 = vst [vmem:[%s1057_s17 + $0xc0] sm:$0xff] %v446_v52  ;;  %v237_v52 = vld [vmem:[%s993_s25 + $0x138] sm:$0xff]  ;;  %v455_v60 = vadd.f32 %v1013_v6, %v327_v43  ;;  %v246_v43 = vld [vmem:[%s993_s25 + $0x180] sm:$0xff] }
  0x69   : > { %543 = vst [vmem:[%s1057_s17 + $0xc8] sm:$0xff] %v447_v61  ;;  %v454_v61 = vadd.f32 %v1009_v4, %v326_v31  ;;  %v245_v31 = vld [vmem:[%s993_s25 + $0x178] sm:$0xff]  ;;  %v333_v35 = vmul.f32 %v1053_v28, %v237_v52  ;;  %v458_v52 = vadd.f32 %v1038_v19, %v330_v63  ;;  %v463_v63 = vadd.f32 %v1102_v51, %v335_v47  ;;  %v250_v47 = vld [vmem:[%s993_s25 + $0x1a0] sm:$0xff] }
  0x6a   : > { %544 = vst [vmem:[%s1057_s17 + $0xd0] sm:$0xff] %v448_v13  ;;  %v243_v13 = vld [vmem:[%s993_s25 + $0x168] sm:$0xff]  ;;  %v341_v49 = vmul.f32 %v1134_v8, %v245_v31  ;;  %v264_v31 = vld [vmem:[%s993_s25 + $0x210] sm:$0xff] }
  0x6b   : > { %545 = vst [vmem:[%s1057_s17 + $0xd8] sm:$0xff] %v449_v25  ;;  %v331_v25 = vmul.f32 %v1041_v20, %v235_v1  ;;  %v337_v1 = vmul.f32 %v1096_v48, %v241_v33  ;;  %v247_v33 = vld [vmem:[%s993_s25 + $0x188] sm:$0xff]  ;;  %v461_v44 = vadd.f32 %v1077_v38, %v333_v35 }
  0x6c   : > { %546 = vst [vmem:[%s1057_s17 + $0xe0] sm:$0xff] %v450_v41  ;;  %v336_v41 = vmul.f32 %v1085_v42, %v240_v58  ;;  %v342_v58 = vmul.f32 %v1138_v10, %v246_v43  ;;  %v266_v10 = vld [vmem:[%s993_s25 + $0x220] sm:$0xff] }
  0x6d   : > { %547 = vst [vmem:[%s1057_s17 + $0xe8] sm:$0xff] %v451_v21  ;;  %v339_v21 = vmul.f32 %v1113_v56, %v243_v13  ;;  %v465_v43 = vadd.f32 %v1119_v59, %v337_v1  ;;  %v343_v1 = vmul.f32 %v1151_v22, %v247_v33  ;;  %v360_v33 = vmul.f32 %v1016_v7, %v264_v31 }
  0x6e   : > { %548 = vst [vmem:[%s1057_s17 + $0xf0] sm:$0xff] %v452_v55  ;;  %v459_v55 = vadd.f32 %v1062_v30, %v331_v25  ;;  %v464_v13 = vadd.f32 %v1106_v53, %v336_v41  ;;  %v249_v25 = vld [vmem:[%s993_s25 + $0x198] sm:$0xff] }
  0x6f   : > { %549 = vst [vmem:[%s1057_s17 + $0xf8] sm:$0xff] %v453_v24  ;;  %v262_v24 = vld [vmem:[%s993_s25 + $0x200] sm:$0xff]  ;;  %v1383_v35 = vadd.f32 %v1143_v15, %v339_v21  ;;  %v265_v41 = vld [vmem:[%s993_s25 + $0x218] sm:$0xff] }
  0x70   : > { %550 = vst [vmem:[%s1057_s17 + $0x100] sm:$0xff] %v454_v61  ;;  %v462_v61 = vadd.f32 %v1091_v45, %v334_v39  ;;  %v1386_v39 = vadd.f32 %v1147_v18, %v340_v50  ;;  %v358_v21 = vmul.f32 %v1001_v0, %v262_v24  ;;  %v267_v50 = vld [vmem:[%s993_s25 + $0x228] sm:$0xff]  ;;  %v270_v0 = vld [vmem:[%s993_s25 + $0x240] sm:$0xff]  ;;  %v1806_v24 = vld [vmem:[#allocation15_spill] sm:$0xff] }
  0x71   : > { %551 = vst [vmem:[%s1057_s17 + $0x108] sm:$0xff] %v455_v60  ;;  %v1380_v60 = vadd.f32 %v1130_v3, %v338_v23  ;;  %v1397_v23 = vmul.f32 %v1161_v29, %v248_v46  ;;  %v269_v46 = vld [vmem:[%s993_s25 + $0x238] sm:$0xff]  ;;  %v363_v31 = vmul.f32 %v1041_v20, %v267_v50  ;;  %v275_v20 = vld [vmem:[%s993_s25 + $0x268] sm:$0xff] }
  0x72   : > { %552 = vst [vmem:[%s1057_s17 + $0x110] sm:$0xff] %v456_v16  ;;  %v1393_v16 = vadd.f32 %v1158_v27, %v341_v49  ;;  %v359_v49 = vmul.f32 %v1005_v2, %v263_v5  ;;  %v271_v2 = vld [vmem:[%s993_s25 + $0x248] sm:$0xff]  ;;  %v272_v5 = vld [vmem:[%s993_s25 + $0x250] sm:$0xff] }
  0x73   : > { %1803 = vst [vmem:[#allocation41_spill] sm:$0xff] %v1383_v35  ;;  %v1404_v35 = vadd.f32 %v1168_v36, %v342_v58  ;;  %v361_v58 = vmul.f32 %v1025_v12, %v265_v41  ;;  %v273_v12 = vld [vmem:[%s993_s25 + $0x258] sm:$0xff] }
  0x74   : > { %1804 = vst [vmem:[#allocation42_spill] sm:$0xff] %v1386_v39  ;;  %v268_v39 = vld [vmem:[%s993_s25 + $0x230] sm:$0xff]  ;;  %v1426_v7 = vadd.f32 %v1013_v6, %v359_v49  ;;  %v365_v6 = vmul.f32 %v1053_v28, %v269_v46 }
  0x75   : > { %553 = vst [vmem:[%s1057_s17 + $0x118] sm:$0xff] %v457_v57  ;;  %v1407_v57 = vmul.f32 %v1171_v37, %v249_v25  ;;  %v362_v25 = vmul.f32 %v1029_v14, %v266_v10  ;;  %v1437_v14 = vadd.f32 %v1034_v17, %v361_v58  ;;  %v367_v17 = vmul.f32 %v1081_v40, %v271_v2  ;;  %v251_v40 = vld [vmem:[%s993_s25 + $0x1a8] sm:$0xff]  ;;  %v1812_v58 = vld [vmem:[#allocation16_spill] sm:$0xff]  ;;  %v1813_v2 = vld [vmem:[#allocation19_spill] sm:$0xff] }
  0x76   : > { %1805 = vst [vmem:[#allocation43_spill] sm:$0xff] %v1393_v16  ;;  %v1415_v16 = vmul.f32 %v1806_v24, %v250_v47  ;;  %v274_v47 = vld [vmem:[%s993_s25 + $0x260] sm:$0xff]  ;;  %v1457_v28 = vadd.f32 %v1077_v38, %v365_v6  ;;  %v371_v38 = vmul.f32 %v1113_v56, %v275_v20  ;;  %v279_v56 = vld [vmem:[%s993_s25 + $0x288] sm:$0xff] }
  0x77   : > { %554 = vst [vmem:[%s1057_s17 + $0x120] sm:$0xff] %v458_v52  ;;  %v1418_v52 = vadd.f32 %v1009_v4, %v358_v21  ;;  %v364_v4 = vmul.f32 %v1049_v26, %v268_v39  ;;  %v1440_v10 = vadd.f32 %v1038_v19, %v362_v25  ;;  %v1447_v26 = vadd.f32 %v1062_v30, %v363_v31  ;;  %v255_v31 = vld [vmem:[%s993_s25 + $0x1c8] sm:$0xff]  ;;  %v1816_v6 = vld [vmem:[#allocation21_spill] sm:$0xff] }
  0x78   : > { %555 = vst [vmem:[%s1057_s17 + $0x128] sm:$0xff] %v459_v55  ;;  %v1429_v55 = vadd.f32 %v1022_v11, %v360_v33  ;;  %v366_v11 = vmul.f32 %v1070_v34, %v270_v0  ;;  %v368_v19 = vmul.f32 %v1085_v42, %v272_v5  ;;  %v369_v30 = vmul.f32 %v1096_v48, %v273_v12  ;;  %v278_v48 = vld [vmem:[%s993_s25 + $0x280] sm:$0xff]  ;;  %v281_v0 = vld [vmem:[%s993_s25 + $0x298] sm:$0xff]  ;;  %v1815_v12 = vld [vmem:[#allocation18_spill] sm:$0xff] }
  0x79   : > { %556 = vst [vmem:[%s1057_s17 + $0x130] sm:$0xff] %v460_v9  ;;  %v1450_v9 = vadd.f32 %v1066_v32, %v364_v4  ;;  %v370_v32 = vmul.f32 %v1109_v54, %v274_v47  ;;  %v1468_v42 = vadd.f32 %v1102_v51, %v367_v17  ;;  %v252_v54 = vld [vmem:[%s993_s25 + $0x1b0] sm:$0xff]  ;;  %v1492_v50 = vadd.f32 %v1143_v15, %v371_v38  ;;  %v1810_v33 = vld [vmem:[#allocation17_spill] sm:$0xff] }
  0x7a   : > { %557 = vst [vmem:[%s1057_s17 + $0x138] sm:$0xff] %v461_v44  ;;  %v276_v44 = vld [vmem:[%s993_s25 + $0x270] sm:$0xff]  ;;  %v1460_v34 = vadd.f32 %v1091_v45, %v366_v11  ;;  %v1809_v49 = vld [vmem:[#allocation41_spill] sm:$0xff]  ;;  %v347_v46 = vmul.f32 %v1810_v33, %v251_v40  ;;  %v472_v25 = vadd.f32 %v1812_v58, %v1397_v23  ;;  %v348_v5 = vmul.f32 %v1813_v2, %v252_v54 }
  0x7b   : > { %558 = vst [vmem:[%s1057_s17 + $0x140] sm:$0xff] %v462_v61  ;;  %v277_v61 = vld [vmem:[%s993_s25 + $0x278] sm:$0xff]  ;;  %v372_v45 = vmul.f32 %v1124_v62, %v276_v44  ;;  %v1482_v39 = vadd.f32 %v1130_v3, %v370_v32  ;;  %v1808_v62 = vld [vmem:[#allocation14_spill] sm:$0xff]  ;;  %v375_v3 = vmul.f32 %v1151_v22, %v279_v56  ;;  %v282_v4 = vld [vmem:[%s993_s25 + $0x2a0] sm:$0xff]  ;;  %v473_v47 = vadd.f32 %v1815_v12, %v1407_v57 }
  0x7c   : > { %559 = vst [vmem:[%s1057_s17 + $0x148] sm:$0xff] %v463_v63  ;;  %v1471_v63 = vadd.f32 %v1106_v53, %v368_v19  ;;  %v373_v51 = vmul.f32 %v1134_v8, %v277_v61  ;;  %v1807_v53 = vld [vmem:[#allocation13_spill] sm:$0xff]  ;;  %v471_v21 = vadd.f32 %v1808_v62, %v343_v1  ;;  %v280_v8 = vld [vmem:[%s993_s25 + $0x290] sm:$0xff]  ;;  %v1811_v22 = vld [vmem:[#allocation42_spill] sm:$0xff]  ;;  %v378_v17 = vmul.f32 %v1806_v24, %v282_v4 }
  0x7d   : > { %560 = vst [vmem:[%s1057_s17 + $0x150] sm:$0xff] %v464_v13  ;;  %v1479_v13 = vadd.f32 %v1119_v59, %v369_v30  ;;  %v374_v41 = vmul.f32 %v1807_v53, %v278_v48  ;;  %v1495_v59 = vadd.f32 %v1147_v18, %v372_v45  ;;  %v376_v18 = vmul.f32 %v1161_v29, %v280_v8  ;;  %v1814_v29 = vld [vmem:[#allocation43_spill] sm:$0xff]  ;;  %v283_v19 = vld [vmem:[%s993_s25 + $0x2a8] sm:$0xff]  ;;  %v257_v32 = vld [vmem:[%s993_s25 + $0x1d8] sm:$0xff] }
  0x7e   : > { %561 = vst [vmem:[%s1057_s17 + $0x158] sm:$0xff] %v465_v43  ;;  %v253_v43 = vld [vmem:[%s993_s25 + $0x1b8] sm:$0xff]  ;;  %v1504_v1 = vadd.f32 %v1158_v27, %v373_v51  ;;  %v1518_v27 = vadd.f32 %v1808_v62, %v375_v3  ;;  %v256_v11 = vld [vmem:[%s993_s25 + $0x1d0] sm:$0xff]  ;;  %v379_v40 = vmul.f32 %v1810_v33, %v283_v19  ;;  %v1819_v24 = vld [vmem:[#allocation22_spill] sm:$0xff] }
  0x7f   : > { %562 = vst [vmem:[%s1057_s17 + $0x160] sm:$0xff] %v1380_v60  ;;  %v254_v60 = vld [vmem:[%s993_s25 + $0x1c0] sm:$0xff]  ;;  %v1507_v15 = vadd.f32 %v1168_v36, %v374_v41  ;;  %v377_v36 = vmul.f32 %v1171_v37, %v281_v0  ;;  %v349_v23 = vmul.f32 %v1816_v6, %v253_v43  ;;  %v1529_v20 = vadd.f32 %v1812_v58, %v376_v18  ;;  %v1817_v37 = vld [vmem:[#allocation20_spill] sm:$0xff]  ;;  %v1818_v30 = vld [vmem:[#allocation23_spill] sm:$0xff] }
  0x80   : > { %563 = vst [vmem:[%s1057_s17 + $0x168] sm:$0xff] %v1809_v49  ;;  %v474_v44 = vadd.f32 %v1817_v37, %v1415_v16  ;;  %v350_v57 = vmul.f32 %v1818_v30, %v254_v60  ;;  %v284_v38 = vld [vmem:[%s993_s25 + $0x2b0] sm:$0xff]  ;;  %v475_v45 = vadd.f32 %v1819_v24, %v347_v46  ;;  %v1820_v48 = vld [vmem:[#allocation25_spill] sm:$0xff]  ;;  %v1549_v16 = vadd.f32 %v1817_v37, %v378_v17  ;;  %v285_v53 = vld [vmem:[%s993_s25 + $0x2b8] sm:$0xff] }
  0x81   : > { %564 = vst [vmem:[%s1057_s17 + $0x170] sm:$0xff] %v1811_v22  ;;  %v1540_v61 = vadd.f32 %v1815_v12, %v377_v36  ;;  %v258_v54 = vld [vmem:[%s993_s25 + $0x1e0] sm:$0xff]  ;;  %v380_v51 = vmul.f32 %v1813_v2, %v284_v38  ;;  %v1821_v41 = vld [vmem:[#allocation24_spill] sm:$0xff]  ;;  %v1822_v62 = vld [vmem:[#allocation27_spill] sm:$0xff]  ;;  %v1558_v3 = vadd.f32 %v1819_v24, %v379_v40  ;;  %v381_v8 = vmul.f32 %v1816_v6, %v285_v53 }
  0x82   : > { %565 = vst [vmem:[%s1057_s17 + $0x178] sm:$0xff] %v1814_v29  ;;  %v476_v56 = vadd.f32 %v1821_v41, %v348_v5  ;;  %v259_v43 = vld [vmem:[%s993_s25 + $0x1e8] sm:$0xff]  ;;  %v286_v49 = vld [vmem:[%s993_s25 + $0x2c0] sm:$0xff]  ;;  %v260_v0 = vld [vmem:[%s993_s25 + $0x1f0] sm:$0xff] }
  0x83   : > { %566 = vst [vmem:[%s1057_s17 + $0x180] sm:$0xff] %v1404_v35  ;;  %v351_v35 = vmul.f32 %v1820_v48, %v255_v31  ;;  %v1823_v33 = vld [vmem:[#allocation26_spill] sm:$0xff]  ;;  %v1824_v60 = vld [vmem:[#allocation29_spill] sm:$0xff]  ;;  %v1567_v22 = vadd.f32 %v1821_v41, %v380_v51  ;;  %v382_v58 = vmul.f32 %v1818_v30, %v286_v49  ;;  %v1825_v2 = vld [vmem:[#allocation28_spill] sm:$0xff] }
  0x84   : > { %567 = vst [vmem:[%s1057_s17 + $0x188] sm:$0xff] %v471_v21  ;;  %v352_v21 = vmul.f32 %v1822_v62, %v256_v11  ;;  %v477_v46 = vadd.f32 %v1823_v33, %v349_v23  ;;  %v353_v18 = vmul.f32 %v1824_v60, %v257_v32  ;;  %v478_v5 = vadd.f32 %v1825_v2, %v350_v57  ;;  %v1826_v31 = vld [vmem:[#allocation31_spill] sm:$0xff]  ;;  %v261_v4 = vld [vmem:[%s993_s25 + $0x1f8] sm:$0xff]  ;;  %v1827_v6 = vld [vmem:[#allocation30_spill] sm:$0xff] }
  0x85   : > { %568 = vst [vmem:[%s1057_s17 + $0x190] sm:$0xff] %v472_v25  ;;  %v287_v25 = vld [vmem:[%s993_s25 + $0x2c8] sm:$0xff]  ;;  %v354_v36 = vmul.f32 %v1826_v31, %v258_v54  ;;  %v1576_v29 = vadd.f32 %v1823_v33, %v381_v8  ;;  %v479_v23 = vadd.f32 %v1827_v6, %v351_v35  ;;  %v1828_v11 = vld [vmem:[#allocation33_spill] sm:$0xff]  ;;  %v510_v19 = vadd.f32 %v1825_v2, %v382_v58  ;;  %v1829_v30 = vld [vmem:[#allocation32_spill] sm:$0xff] }
  0x86   : > { %569 = vst [vmem:[%s1057_s17 + $0x198] sm:$0xff] %v473_v47  ;;  %v383_v12 = vmul.f32 %v1820_v48, %v287_v25  ;;  %v288_v47 = vld [vmem:[%s993_s25 + $0x2d0] sm:$0xff]  ;;  %v355_v17 = vmul.f32 %v1828_v11, %v259_v43  ;;  %v480_v57 = vadd.f32 %v1829_v30, %v352_v21  ;;  %v1831_v48 = vld [vmem:[#allocation34_spill] sm:$0xff]  ;;  %v1832_v54 = vld [vmem:[#allocation37_spill] sm:$0xff] }
  0x87   : > { %570 = vst [vmem:[%s1057_s17 + $0x1a0] sm:$0xff] %v474_v44  ;;  %v384_v37 = vmul.f32 %v1822_v62, %v288_v47  ;;  %v289_v44 = vld [vmem:[%s993_s25 + $0x2d8] sm:$0xff]  ;;  %v1830_v32 = vld [vmem:[#allocation35_spill] sm:$0xff]  ;;  %v481_v35 = vadd.f32 %v1831_v48, %v353_v18  ;;  %v357_v51 = vmul.f32 %v1832_v54, %v261_v4  ;;  %v1834_v33 = vld [vmem:[#allocation38_spill] sm:$0xff] }
  0x88   : > { %571 = vst [vmem:[%s1057_s17 + $0x1a8] sm:$0xff] %v475_v45  ;;  %v356_v40 = vmul.f32 %v1830_v32, %v260_v0  ;;  %v511_v38 = vadd.f32 %v1827_v6, %v383_v12  ;;  %v385_v24 = vmul.f32 %v1824_v60, %v289_v44  ;;  %v290_v45 = vld [vmem:[%s993_s25 + $0x2e0] sm:$0xff]  ;;  %v1833_v62 = vld [vmem:[#allocation36_spill] sm:$0xff]  ;;  %v292_v49 = vld [vmem:[%s993_s25 + $0x2f0] sm:$0xff] }
  0x89   : > { %572 = vst [vmem:[%s1057_s17 + $0x1b0] sm:$0xff] %v476_v56  ;;  %v512_v53 = vadd.f32 %v1829_v30, %v384_v37  ;;  %v386_v41 = vmul.f32 %v1826_v31, %v290_v45  ;;  %v291_v56 = vld [vmem:[%s993_s25 + $0x2e8] sm:$0xff]  ;;  %v482_v21 = vadd.f32 %v1833_v62, %v354_v36  ;;  %v388_v18 = vmul.f32 %v1830_v32, %v292_v49  ;;  %v293_v0 = vld [vmem:[%s993_s25 + $0x2f8] sm:$0xff]  ;;  %v1835_v58 = vld [vmem:[#allocation39_spill] sm:$0xff] }
  0x8a   : > { %573 = vst [vmem:[%s1057_s17 + $0x1b8] sm:$0xff] %v477_v46  ;;  %v513_v43 = vadd.f32 %v1831_v48, %v385_v24  ;;  %v387_v8 = vmul.f32 %v1828_v11, %v291_v56  ;;  %v483_v46 = vadd.f32 %v1834_v33, %v355_v17  ;;  %v484_v25 = vadd.f32 %v1835_v58, %v356_v40  ;;  %v1836_v31 = vld [vmem:[#allocation40_spill] sm:$0xff] }
  0x8b   : > { %574 = vst [vmem:[%s1057_s17 + $0x1c0] sm:$0xff] %v478_v5  ;;  %v514_v60 = vadd.f32 %v1833_v62, %v386_v41  ;;  %v389_v5 = vmul.f32 %v1832_v54, %v293_v0  ;;  %v485_v36 = vadd.f32 %v1836_v31, %v357_v51  ;;  %v516_v4 = vadd.f32 %v1835_v58, %v388_v18 }
  0x8c   : > { %575 = vst [vmem:[%s1057_s17 + $0x1c8] sm:$0xff] %v479_v23  ;;  %v515_v2 = vadd.f32 %v1834_v33, %v387_v8 }
  0x8d   : > { %576 = vst [vmem:[%s1057_s17 + $0x1d0] sm:$0xff] %v480_v57  ;;  %v517_v12 = vadd.f32 %v1836_v31, %v389_v5 }
  0x8e   : > { %577 = vst [vmem:[%s1057_s17 + $0x1d8] sm:$0xff] %v481_v35 }
  0x8f   : > { %578 = vst [vmem:[%s1057_s17 + $0x1e0] sm:$0xff] %v482_v21 }
  0x90   : > { %579 = vst [vmem:[%s1057_s17 + $0x1e8] sm:$0xff] %v483_v46 }
  0x91   : > { %580 = vst [vmem:[%s1057_s17 + $0x1f0] sm:$0xff] %v484_v25 }
  0x92   : > { %581 = vst [vmem:[%s1057_s17 + $0x1f8] sm:$0xff] %v485_v36 }
  0x93   : > { %582 = vst [vmem:[%s1057_s17 + $0x200] sm:$0xff] %v1418_v52 }
  0x94   : > { %583 = vst [vmem:[%s1057_s17 + $0x208] sm:$0xff] %v1426_v7 }
  0x95   : > { %584 = vst [vmem:[%s1057_s17 + $0x210] sm:$0xff] %v1429_v55 }
  0x96   : > { %585 = vst [vmem:[%s1057_s17 + $0x218] sm:$0xff] %v1437_v14 }
  0x97   : > { %586 = vst [vmem:[%s1057_s17 + $0x220] sm:$0xff] %v1440_v10 }
  0x98   : > { %587 = vst [vmem:[%s1057_s17 + $0x228] sm:$0xff] %v1447_v26 }
  0x99   : > { %588 = vst [vmem:[%s1057_s17 + $0x230] sm:$0xff] %v1450_v9 }
  0x9a   : > { %589 = vst [vmem:[%s1057_s17 + $0x238] sm:$0xff] %v1457_v28 }
  0x9b   : > { %590 = vst [vmem:[%s1057_s17 + $0x240] sm:$0xff] %v1460_v34 }
  0x9c   : > { %591 = vst [vmem:[%s1057_s17 + $0x248] sm:$0xff] %v1468_v42 }
  0x9d   : > { %592 = vst [vmem:[%s1057_s17 + $0x250] sm:$0xff] %v1471_v63 }
  0x9e   : > { %593 = vst [vmem:[%s1057_s17 + $0x258] sm:$0xff] %v1479_v13 }
  0x9f   : > { %594 = vst [vmem:[%s1057_s17 + $0x260] sm:$0xff] %v1482_v39 }
  0xa0   : > { %595 = vst [vmem:[%s1057_s17 + $0x268] sm:$0xff] %v1492_v50 }
  0xa1   : > { %596 = vst [vmem:[%s1057_s17 + $0x270] sm:$0xff] %v1495_v59 }
  0xa2   : > { %597 = vst [vmem:[%s1057_s17 + $0x278] sm:$0xff] %v1504_v1 }
  0xa3   : > { %598 = vst [vmem:[%s1057_s17 + $0x280] sm:$0xff] %v1507_v15 }
  0xa4   : > { %599 = vst [vmem:[%s1057_s17 + $0x288] sm:$0xff] %v1518_v27 }
  0xa5   : > { %600 = vst [vmem:[%s1057_s17 + $0x290] sm:$0xff] %v1529_v20 }
  0xa6   : > { %601 = vst [vmem:[%s1057_s17 + $0x298] sm:$0xff] %v1540_v61 }
  0xa7   : > { %602 = vst [vmem:[%s1057_s17 + $0x2a0] sm:$0xff] %v1549_v16 }
  0xa8   : > { %603 = vst [vmem:[%s1057_s17 + $0x2a8] sm:$0xff] %v1558_v3 }
  0xa9   : > { %604 = vst [vmem:[%s1057_s17 + $0x2b0] sm:$0xff] %v1567_v22 }
  0xaa   : > { %605 = vst [vmem:[%s1057_s17 + $0x2b8] sm:$0xff] %v1576_v29 }
  0xab   : > { %606 = vst [vmem:[%s1057_s17 + $0x2c0] sm:$0xff] %v510_v19 }
  0xac   : > { %607 = vst [vmem:[%s1057_s17 + $0x2c8] sm:$0xff] %v511_v38 }
  0xad   : > { %608 = vst [vmem:[%s1057_s17 + $0x2d0] sm:$0xff] %v512_v53 }
  0xae   : > { %609 = vst [vmem:[%s1057_s17 + $0x2d8] sm:$0xff] %v513_v43 }
  0xaf   : > { %610 = vst [vmem:[%s1057_s17 + $0x2e0] sm:$0xff] %v514_v60 }
  0xb0   : > { %611 = vst [vmem:[%s1057_s17 + $0x2e8] sm:$0xff] %v515_v2 }
  0xb1   : > { %612 = vst [vmem:[%s1057_s17 + $0x2f0] sm:$0xff] %v516_v4 }
  0xb2   : > { %613 = vst [vmem:[%s1057_s17 + $0x2f8] sm:$0xff] %v517_v12 }
  0xb3   : > { %s778_s26 = sshll.u32 %s927_s10, 8  ;;  %s638_s27 = sshll.u32 %s1057_s17, 4  ;;  %s639_s27 = int_to_ptr.vmem [resolvable:$true] %s638_s27 }
  0xb4   : > { %s627_s30 = scalar_lea.hbm %s1715_s1, %s778_s26  ;;  %s890_s3 = smov 4096  }
  0xb5   : > { %s640_s2 = sshll.u32 %s627_s30, 4  ;;  %789 = sst [smem:[#allocation9]] (%p954_p9), %s890_s3  ;;  %s641_s2 = int_to_ptr.hbm [resolvable:$true] %s640_s2 }
  0xb6   : > { %s891_s4 = smov 8192   ;;  %s892_s5 = smov 16  }
  0xb7   : > { %790 = sst [smem:[#allocation9 + $0x1]] (%p954_p9), %s891_s4  ;;  %s893_s11 = smov 256  }
  0xb8   : > { %791 = sst [smem:[#allocation9 + $0x2]] (%p954_p9), %s892_s5  ;;  %s894_s10 = smov [#allocation8]  }
  0xb9   : > { %792 = sst [smem:[#allocation9 + $0x3]] (%p954_p9), %s893_s11  ;;  %s895_s13 = smov 0  }
  0xba   : > { %793 = sst [smem:[#allocation9 + $0x4]] (%p954_p9), %s893_s11 }
  0xbb   : > { %794 = sst [smem:[#allocation9 + $0x5]] (%p954_p9), %s892_s5 }
  0xbc   : > { %795 = dma.general (%p954_p9), %s639_s27, 12288, %s641_s2, %s615_s20, %s894_s10, [#allocation9], %s895_s13, 0  }
  0xbd PF: > { %s668_s14 = sand.u32 1, %s871_s6   ;;  %p798_p1 = pnand %p729_p11, %p958_p10 }
  0xbe   : > { %s669_s21 = scalar_lea.sflag [#allocation4], %s668_s14 }
  0xbf   : > { %p799_p2 = pneg %p798_p1 }
  0xc1   : > { %866 = dma.done.wait (%p799_p2), %s669_s21, 12288  }
  0xc2   : > { %868 = vsyncadd (%p799_p2), %s669_s21, 4294955008  ;;  %p14_p3 = scmp.ge.s32.totalorder %s931_s12, 4   ;;  %s1837_s6 = smov %s875_s7 }
  0xc3   : > { %s1838_s7 = smov %s879_s8  ;;  %s1839_s8 = smov %s943_s15 }
  0xc4   : > { %s1840_s9 = smov %s931_s12  ;;  %16 = sbr.rel (!%p14_p3) target bundleno = 5 (0x5), region = 80 }
  0xc9   :  { %675 = vsyncpa [#allocation3], 1 }
  0xca   :  { %677 = vsyncpa [#allocation3 + $0x1], 1 }
  0xcb   :  { %678 = vsyncpa [#allocation4], 1 }
  0xcc   :  { %680 = vsyncpa [#allocation4 + $0x1], 1 }

</bundles_post_ra>
